<compile_context>
chip_gen: v7x
topology: tpu7x:2x2x1
jax: 0.10.0
libtpu: 0.0.40
codegen_flags: <defaults>
</compile_context>

<pallas_src>
import jax
import jax.numpy as jnp
from jax.experimental import pallas as pl
from jax.experimental.pallas import tpu as pltpu


def _round_up(x, m):
    return -(-x // m) * m


def _vmem_capacity_bytes():
    try:
        info = pltpu.get_tpu_info()
        cap = int(getattr(info, "vmem_capacity_bytes", 0) or 0)
        if cap > 0:
            return cap
    except Exception:
        pass
    return 64 * 2 ** 20            # conservative default: v7x per-TensorCore VMEM


def _num_tensorcores():
    try:
        return max(1, int(getattr(jax.devices()[0], "num_cores", 1)))
    except Exception:
        return 1


def _make_tap_kernel(tap_offsets, tile_r):
    """M*M small dots against per-tap weights; tap gather = shifted VMEM slices."""
    def kernel(x_ref, w_ref, o_ref, acc_ref):
        # x_ref : (Cin_pad, slab_len) bf16  -- row tile + halo, rows on lanes (dense)
        # w_ref : (M*M, CO_pad, Cin_pad) bf16 -- per-tap weights, resident
        # o_ref : (CO_pad, tile_r) bf16 ; acc_ref: (CO_pad, tile_r) f32 scratch
        for jj, off in enumerate(tap_offsets):
            xs = x_ref[:, off:off + tile_r]              # tap gather in VMEM
            d = jnp.dot(w_ref[jj], xs, preferred_element_type=jnp.float32)
            if jj == 0:
                acc_ref[...] = d
            else:
                acc_ref[...] += d
        o_ref[...] = acc_ref[...].astype(o_ref.dtype)
    return kernel


def concat_convtrans(x_nchw, concat_list, w_pt, *, stride, padding,
                     compute_dtype=jnp.bfloat16):
    """Equivalent of ConcatConvTrans.forward (bias=False, groups=1).

    w_pt has PyTorch ConvTranspose2d layout (Cin, OC, K, K)."""
    # TODO(synk): groups != 1 and bias=True are not implemented (module defaults).
    if not isinstance(concat_list, (list, tuple)):
        concat_list = [concat_list]
    xc = jnp.concatenate([x_nchw] + list(concat_list), axis=1)    # (N, Cin, H, W)

    N, Cin, H, W = xc.shape
    Cin_w, OC, K, _ = w_pt.shape
    assert Cin == Cin_w, "inplanes must equal channels(x) + sum(channels(concat))"
    s, p = stride, padding
    OH = (H - 1) * s - 2 * p + K
    OW = (W - 1) * s - 2 * p + K
    assert OH > 0 and OW > 0

    esize = jnp.dtype(compute_dtype).itemsize
    sub_pack = max(8, 32 // esize)            # 16 for bf16, 8 for f32

    # ---- sub-pixel (phase) decomposition: per-tap (CO, Cin) weights ---------
    M = -(-K // s)                            # taps per axis per output phase
    Qh, Qw = H + M - 1, W + M - 1             # phase grid before crop
    Hp, Wp = H + 2 * (M - 1), W + 2 * (M - 1)
    CO = s * s * OC
    Cin_pad = _round_up(Cin, sub_pack)
    CO_pad = _round_up(CO, sub_pack)

    # kernel tap used by phase (rh, rw) at neighborhood offset (jh, jw) is
    # (kh, kw) = (rh + s*(M-1-jh), rw + s*(M-1-jw)); taps past K are zero.
    # TODO(synk): structurally-zero taps for K % s != 0 are kept dense (M*M).
    w_sub = jnp.zeros((s, s, M, M, Cin, OC), jnp.float32)
    for rh in range(s):
        for rw in range(s):
            for jh in range(M):
                for jw in range(M):
                    kh = rh + s * (M - 1 - jh)
                    kw = rw + s * (M - 1 - jw)
                    if kh < K and kw < K:
                        w_sub = w_sub.at[rh, rw, jh, jw].set(
                            w_pt[:, :, kh, kw].astype(jnp.float32))
    # (M*M, CO, Cin) with CO index = (rh*s + rw)*OC + oc
    w_taps = jnp.transpose(w_sub, (2, 3, 0, 1, 5, 4)).reshape(M * M, CO, Cin)
    w_taps = jnp.pad(w_taps, ((0, 0), (0, CO_pad - CO), (0, Cin_pad - Cin)))
    w_taps = w_taps.astype(compute_dtype)

    # ---- flat-row layout: batch merged into one lane-dense row axis ---------
    # row r = n*Hp*Wp + qh*Wp + qw ; tap (jh, jw) reads row r + jh*Wp + jw.
    x_pad = jnp.pad(xc, ((0, 0), (0, Cin_pad - Cin),
                         (M - 1, M - 1), (M - 1, M - 1))).astype(compute_dtype)
    x_flat = jnp.transpose(x_pad, (1, 0, 2, 3)).reshape(Cin_pad, N * Hp * Wp)
    Rtot = N * Hp * Wp
    halo = (M - 1) * (Wp + 1)
    halo_pad = _round_up(halo, 128) if halo > 0 else 0

    # ---- VMEM-budget-driven row tile ----------------------------------------
    vmem_cap = _vmem_capacity_bytes()
    budget = int(0.45 * vmem_cap)                      # per-step working set
    w_bytes = M * M * CO_pad * Cin_pad * esize         # single-buffered weight
    fixed = w_bytes + 2 * Cin_pad * halo_pad * esize
    per128 = (2 * Cin_pad * 128 * esize                # double-buffered input slab
              + 2 * CO_pad * 128 * esize               # double-buffered output tile
              + 2 * CO_pad * 128 * 4                   # f32 acc + dot temporary
              + Cin_pad * 128 * esize)                 # shifted-slice temporary
    max_chunks = max(1, (budget - fixed) // per128)
    n_chunks = min(max_chunks, -(-Rtot // 128))
    tile_r = max(128, n_chunks * 128)
    n_tiles = -(-Rtot // tile_r)

    cores = _num_tensorcores()
    if cores > 1 and Rtot > 128:
        # balanced (even) split across TensorCores; this can only shrink tile_r
        target = _round_up(n_tiles, cores)
        tile_r = max(128, _round_up(-(-Rtot // target), 128))
        n_tiles = _round_up(-(-Rtot // tile_r), cores)

    R_cover = n_tiles * tile_r
    slab_len = tile_r + halo_pad
    x_ext = jnp.pad(x_flat, ((0, 0), (0, R_cover + halo_pad - Rtot)))
    # overlapping slabs (tile + halo): the only HBM-side copy (~halo/tile extra)
    x_slabs = jnp.stack([x_ext[:, t * tile_r:t * tile_r + slab_len]
                         for t in range(n_tiles)], axis=0)

    tile_bytes = (2 * Cin_pad * slab_len * esize + w_bytes
                  + 2 * CO_pad * tile_r * esize + CO_pad * tile_r * 4)
    vmem_limit = int(min(0.8 * vmem_cap,
                         max(32 * 2 ** 20, tile_bytes + 8 * 2 ** 20)))

    tap_offsets = tuple(jh * Wp + jw for jh in range(M) for jw in range(M))
    kernel = _make_tap_kernel(tap_offsets, tile_r)

    try:
        squeezed = pl.Squeezed()
    except Exception:
        squeezed = None                                   # classic spelling
    try:
        w_spec = pl.BlockSpec((M * M, CO_pad, Cin_pad), lambda t: (0, 0, 0),
                              pipeline_mode=pl.Buffered(1))
    except Exception:
        w_spec = pl.BlockSpec((M * M, CO_pad, Cin_pad), lambda t: (0, 0, 0))

    out_rows = pl.pallas_call(
        kernel,
        out_shape=jax.ShapeDtypeStruct((CO_pad, R_cover), compute_dtype),
        grid_spec=pltpu.PrefetchScalarGridSpec(
            num_scalar_prefetch=0,
            grid=(n_tiles,),
            in_specs=[
                pl.BlockSpec((squeezed, Cin_pad, slab_len), lambda t: (t, 0, 0)),
                w_spec,
            ],
            out_specs=pl.BlockSpec((CO_pad, tile_r), lambda t: (0, t)),
            scratch_shapes=[pltpu.VMEM((CO_pad, tile_r), jnp.float32)],
        ),
        compiler_params=pltpu.CompilerParams(
            dimension_semantics=("parallel",),
            vmem_limit_bytes=vmem_limit),
    )(x_slabs, w_taps)

    # ---- depth-to-space + crop (stay bf16 until the very end) ---------------
    val = out_rows[:CO, :Rtot].reshape(CO, N, Hp, Wp)[:, :, :Qh, :Qw]
    val = val.reshape(s, s, OC, N, Qh, Qw)
    out = jnp.transpose(val, (3, 2, 4, 0, 5, 1)).reshape(N, OC, Qh * s, Qw * s)
    return out[:, :, p:p + OH, p:p + OW].astype(jnp.float32)


def _ref_convtranspose2d(x_nchw, w_pt, *, stride, padding):
    """Direct (scatter-add) reference implementing PyTorch ConvTranspose2d semantics."""
    N, Cin, H, W = x_nchw.shape
    _, OC, K, _ = w_pt.shape
    full = jnp.zeros((N, OC, (H - 1) * stride + K, (W - 1) * stride + K), jnp.float32)
    for kh in range(K):
        for kw in range(K):
            contrib = jnp.einsum('nchw,co->nohw', x_nchw, w_pt[:, :, kh, kw])
            full = full.at[:, :,
                           kh:kh + (H - 1) * stride + 1:stride,
                           kw:kw + (W - 1) * stride + 1:stride].add(contrib)
    OH = (H - 1) * stride - 2 * padding + K
    OW = (W - 1) * stride - 2 * padding + K
    return full[:, :, padding:padding + OH, padding:padding + OW]


if __name__ == "__main__":
    # Module config: ConcatConvTrans(inplanes=8, planes=4, kernel_size=4, stride=2, padding=1)
    inplanes, planes, kernel_size, stride, padding = 8, 4, 4, 2, 1
    N, H, W = 2, 16, 16

    key = jax.random.PRNGKey(0)
    kx, kc, kw = jax.random.split(key, 3)
    x = jax.random.normal(kx, (N, 4, H, W), jnp.float32)            # main input (NCHW)
    skip = jax.random.normal(kc, (N, 4, H, W), jnp.float32)         # concat tensor (NCHW)
    # deterministic ConvTranspose2d weight, PyTorch layout (Cin, OC, K, K), bias=False
    w_pt = 0.1 * jax.random.normal(kw, (inplanes, planes, kernel_size, kernel_size),
                                   jnp.float32)

    out = concat_convtrans(x, [skip], w_pt, stride=stride, padding=padding)
    out = jax.block_until_ready(out)

    ref = _ref_convtranspose2d(jnp.concatenate([x, skip], axis=1), w_pt,
                               stride=stride, padding=padding)
    OH = (H - 1) * stride - 2 * padding + kernel_size
    OW = (W - 1) * stride - 2 * padding + kernel_size
    assert out.shape == (N, planes, OH, OW)
    # bf16 operands / f32 accumulation -> loosened tolerance vs the f32 reference
    assert jnp.allclose(out, ref, atol=3e-2, rtol=3e-2), "mismatch vs reference"

    print("KERNEL_OK")
</pallas_src>

<mosaic_0001>
module attributes {stable_mosaic.version = 11 : i64} {
  func.func @kernel(%arg0: i32, %arg1: memref<1x16x896xbf16, #tpu.memory_space<vmem>>, %arg2: memref<4x16x16xbf16, #tpu.memory_space<vmem>>, %arg3: memref<16x768xbf16, #tpu.memory_space<vmem>>, %arg4: memref<16x768xf32, #tpu.memory_space<vmem>>) attributes {dimension_semantics = [#tpu.dimension_semantics<parallel>], iteration_bounds = array<i64: 1>, scalar_prefetch = 0 : i64, scratch_operands = 1 : i64, tpu.core_type = #tpu.core_type<tc>, window_params = [{transform_indices = @transform_0, window_bounds = array<i64: 1, 16, 896>}, {pipeline_mode = #tpu.pipeline_mode<synchronous>, transform_indices = @transform_1, window_bounds = array<i64: 4, 16, 16>}, {transform_indices = @transform_2, window_bounds = array<i64: 16, 768>}]} {
    %c0 = arith.constant 0 : index
    %c0_0 = arith.constant 0 : index
    %c0_1 = arith.constant 0 : index
    %0 = vector.load %arg1[%c0, %c0_0, %c0_1] : memref<1x16x896xbf16, #tpu.memory_space<vmem>>, vector<1x16x768xbf16>
    %1 = vector.shape_cast %0 : vector<1x16x768xbf16> to vector<16x768xbf16>
    %c0_2 = arith.constant 0 : index
    %c0_3 = arith.constant 0 : index
    %c0_4 = arith.constant 0 : index
    %2 = vector.load %arg2[%c0_2, %c0_3, %c0_4] : memref<4x16x16xbf16, #tpu.memory_space<vmem>>, vector<1x16x16xbf16>
    %3 = vector.shape_cast %2 : vector<1x16x16xbf16> to vector<16x16xbf16>
    %cst = arith.constant dense<0.000000e+00> : vector<16x768xf32>
    %4 = tpu.matmul %3, %1, %cst {dimension_numbers = #tpu.dot_dimension_numbers<[1], [0], [0], [1], [0, 0, 1, 1], [], []>} : vector<16x16xbf16>, vector<16x768xbf16>, vector<16x768xf32> -> vector<16x768xf32>
    %c0_5 = arith.constant 0 : index
    %c0_6 = arith.constant 0 : index
    %5 = vector.load %arg4[%c0_5, %c0_6] : memref<16x768xf32, #tpu.memory_space<vmem>>, vector<16x768xf32>
    tpu.vector_store %arg4[%c0_5, %c0_6], %4 {strides = array<i32>} : memref<16x768xf32, #tpu.memory_space<vmem>>, vector<16x768xf32>,
    %c0_7 = arith.constant 0 : index
    %c0_8 = arith.constant 0 : index
    %c1 = arith.constant 1 : index
    %6 = vector.load %arg1[%c0_7, %c0_8, %c1] : memref<1x16x896xbf16, #tpu.memory_space<vmem>>, vector<1x16x768xbf16>
    %7 = vector.shape_cast %6 : vector<1x16x768xbf16> to vector<16x768xbf16>
    %c1_9 = arith.constant 1 : index
    %c0_10 = arith.constant 0 : index
    %c0_11 = arith.constant 0 : index
    %8 = vector.load %arg2[%c1_9, %c0_10, %c0_11] : memref<4x16x16xbf16, #tpu.memory_space<vmem>>, vector<1x16x16xbf16>
    %9 = vector.shape_cast %8 : vector<1x16x16xbf16> to vector<16x16xbf16>
    %cst_12 = arith.constant dense<0.000000e+00> : vector<16x768xf32>
    %10 = tpu.matmul %9, %7, %cst_12 {dimension_numbers = #tpu.dot_dimension_numbers<[1], [0], [0], [1], [0, 0, 1, 1], [], []>} : vector<16x16xbf16>, vector<16x768xbf16>, vector<16x768xf32> -> vector<16x768xf32>
    %c0_13 = arith.constant 0 : index
    %c0_14 = arith.constant 0 : index
    %11 = vector.load %arg4[%c0_13, %c0_14] : memref<16x768xf32, #tpu.memory_space<vmem>>, vector<16x768xf32>
    %12 = arith.addf %11, %10 : vector<16x768xf32>
    %c0_15 = arith.constant 0 : index
    %c0_16 = arith.constant 0 : index
    %13 = vector.load %arg4[%c0_15, %c0_16] : memref<16x768xf32, #tpu.memory_space<vmem>>, vector<16x768xf32>
    tpu.vector_store %arg4[%c0_15, %c0_16], %12 {strides = array<i32>} : memref<16x768xf32, #tpu.memory_space<vmem>>, vector<16x768xf32>,
    %c0_17 = arith.constant 0 : index
    %c0_18 = arith.constant 0 : index
    %c18 = arith.constant 18 : index
    %14 = vector.load %arg1[%c0_17, %c0_18, %c18] : memref<1x16x896xbf16, #tpu.memory_space<vmem>>, vector<1x16x768xbf16>
    %15 = vector.shape_cast %14 : vector<1x16x768xbf16> to vector<16x768xbf16>
    %c2 = arith.constant 2 : index
    %c0_19 = arith.constant 0 : index
    %c0_20 = arith.constant 0 : index
    %16 = vector.load %arg2[%c2, %c0_19, %c0_20] : memref<4x16x16xbf16, #tpu.memory_space<vmem>>, vector<1x16x16xbf16>
    %17 = vector.shape_cast %16 : vector<1x16x16xbf16> to vector<16x16xbf16>
    %cst_21 = arith.constant dense<0.000000e+00> : vector<16x768xf32>
    %18 = tpu.matmul %17, %15, %cst_21 {dimension_numbers = #tpu.dot_dimension_numbers<[1], [0], [0], [1], [0, 0, 1, 1], [], []>} : vector<16x16xbf16>, vector<16x768xbf16>, vector<16x768xf32> -> vector<16x768xf32>
    %c0_22 = arith.constant 0 : index
    %c0_23 = arith.constant 0 : index
    %19 = vector.load %arg4[%c0_22, %c0_23] : memref<16x768xf32, #tpu.memory_space<vmem>>, vector<16x768xf32>
    %20 = arith.addf %19, %18 : vector<16x768xf32>
    %c0_24 = arith.constant 0 : index
    %c0_25 = arith.constant 0 : index
    %21 = vector.load %arg4[%c0_24, %c0_25] : memref<16x768xf32, #tpu.memory_space<vmem>>, vector<16x768xf32>
    tpu.vector_store %arg4[%c0_24, %c0_25], %20 {strides = array<i32>} : memref<16x768xf32, #tpu.memory_space<vmem>>, vector<16x768xf32>,
    %c0_26 = arith.constant 0 : index
    %c0_27 = arith.constant 0 : index
    %c19 = arith.constant 19 : index
    %22 = vector.load %arg1[%c0_26, %c0_27, %c19] : memref<1x16x896xbf16, #tpu.memory_space<vmem>>, vector<1x16x768xbf16>
    %23 = vector.shape_cast %22 : vector<1x16x768xbf16> to vector<16x768xbf16>
    %c3 = arith.constant 3 : index
    %c0_28 = arith.constant 0 : index
    %c0_29 = arith.constant 0 : index
    %24 = vector.load %arg2[%c3, %c0_28, %c0_29] : memref<4x16x16xbf16, #tpu.memory_space<vmem>>, vector<1x16x16xbf16>
    %25 = vector.shape_cast %24 : vector<1x16x16xbf16> to vector<16x16xbf16>
    %cst_30 = arith.constant dense<0.000000e+00> : vector<16x768xf32>
    %26 = tpu.matmul %25, %23, %cst_30 {dimension_numbers = #tpu.dot_dimension_numbers<[1], [0], [0], [1], [0, 0, 1, 1], [], []>} : vector<16x16xbf16>, vector<16x768xbf16>, vector<16x768xf32> -> vector<16x768xf32>
    %c0_31 = arith.constant 0 : index
    %c0_32 = arith.constant 0 : index
    %27 = vector.load %arg4[%c0_31, %c0_32] : memref<16x768xf32, #tpu.memory_space<vmem>>, vector<16x768xf32>
    %28 = arith.addf %27, %26 : vector<16x768xf32>
    %c0_33 = arith.constant 0 : index
    %c0_34 = arith.constant 0 : index
    %29 = vector.load %arg4[%c0_33, %c0_34] : memref<16x768xf32, #tpu.memory_space<vmem>>, vector<16x768xf32>
    tpu.vector_store %arg4[%c0_33, %c0_34], %28 {strides = array<i32>} : memref<16x768xf32, #tpu.memory_space<vmem>>, vector<16x768xf32>,
    %c0_35 = arith.constant 0 : index
    %c0_36 = arith.constant 0 : index
    %30 = vector.load %arg4[%c0_35, %c0_36] : memref<16x768xf32, #tpu.memory_space<vmem>>, vector<16x768xf32>
    %31 = arith.truncf %30 : vector<16x768xf32> to vector<16x768xbf16>
    %c0_37 = arith.constant 0 : index
    %c0_38 = arith.constant 0 : index
    %32 = vector.load %arg3[%c0_37, %c0_38] : memref<16x768xbf16, #tpu.memory_space<vmem>>, vector<16x768xbf16>
    tpu.vector_store %arg3[%c0_37, %c0_38], %31 {strides = array<i32>} : memref<16x768xbf16, #tpu.memory_space<vmem>>, vector<16x768xbf16>,
    return
  }
  func.func @transform_0(%arg0: i32) -> (i32, i32, i32) {
    %c0_i32 = arith.constant 0 : i32
    %c0_i32_0 = arith.constant 0 : i32
    %c0_i32_1 = arith.constant 0 : i32
    return %arg0, %c0_i32, %c0_i32_0 : i32, i32, i32
  }
  func.func @transform_1(%arg0: i32) -> (i32, i32, i32) {
    %c0_i32 = arith.constant 0 : i32
    %c0_i32_0 = arith.constant 0 : i32
    %c0_i32_1 = arith.constant 0 : i32
    %c0_i32_2 = arith.constant 0 : i32
    return %c0_i32, %c0_i32_0, %c0_i32_1 : i32, i32, i32
  }
  func.func @transform_2(%arg0: i32) -> (i32, i32) {
    %c0_i32 = arith.constant 0 : i32
    %c0_i32_0 = arith.constant 0 : i32
    return %c0_i32, %arg0 : i32, i32
  }
}

</mosaic_0001>

<bundles_post_ra>
// kernel: tpu_custom_call.1
= control target key start
LH: loop header
LB: loop body
LE: loop exit
PB: predicated region body
PF: predicated region fallthrough
CT: control target
= control target key end

     0   :  { %7 = vsyncpa [#allocation4], 0  ;;  %s1319_s0 = inlined_call_operand.hbm [shape: bf16[1,16,896], index: 0, kind: input, shape index: {}]   ;;  %s1320_s1 = inlined_call_operand.hbm [shape: bf16[4,16,16], index: 1, kind: input, shape index: {}]   ;;  %s1321_s2 = inlined_call_operand.hbm [shape: bf16[16,768], index: 2, kind: output, shape index: {}]  }
   0x1   :  { %8 = vsyncpa [#allocation7], 0 }
   0x2   :  { %9 = vsyncpa [#allocation5], 0  ;;  %s1213_s9 = smov [#allocation3]   ;;  %s1141_s13 = scalar_lea.hbm %s1319_s0, 896 }
   0x3   :  { %s15_s10 = sshll.u32 %s1213_s9, 4  ;;  %p1142_p0 = scmp.ne.s32.totalorder %s1319_s0, %s1141_s13  ;;  %s16_s10 = int_to_ptr.vmem [resolvable:$true] %s15_s10 }
   0x4   :  { %p1145_p1 = scmp.lt.u32.totalorder %s1141_s13, %s1319_s0 }
   0x6   :  { %p1147_p2 = pnand %p1145_p1, %p1142_p0 }
   0x8   :  { %1150 = shalt.err (!%p1147_p2)
}
   0x9   :  { %s1151_s18 = scalar_lea.vmem %s16_s10, 896  ;;  %p1156_p4 = scmp.lt.s32.totalorder %s16_s10, %s16_s10 }
   0xa   :  { %p1152_p3 = scmp.ne.s32.totalorder %s16_s10, %s1151_s18  ;;  %p1157_p5 = scmp.lt.s32.totalorder %s1151_s18, %s1151_s18 }
   0xc   :  { %p1158_p6 = por %p1157_p5, %p1156_p4 }
   0xe   :  { %p1159_p7 = pnand %p1158_p6, %p1152_p3 }
  0x10   :  { %1162 = shalt.err (!%p1159_p7)
}
  0x11   :  { %s1214_s19 = smov 448   ;;  %s1215_s20 = smov 28  }
  0x12   :  { %21 = dma.hbm_to_vmem [thread:$0]  %s1319_s0, 896, %s16_s10, [#allocation4], %s1214_s19, %s1214_s19, %s1215_s20  }
  0x13   :  { %s1216_s23 = smov [#allocation6]   ;;  %s1163_s27 = scalar_lea.hbm %s1320_s1, 512 }
  0x14   :  { %s27_s24 = sshll.u32 %s1216_s23, 4  ;;  %p1164_p8 = scmp.ne.s32.totalorder %s1320_s1, %s1163_s27  ;;  %s28_s24 = int_to_ptr.vmem [resolvable:$true] %s27_s24 }
  0x15   :  { %p1167_p9 = scmp.lt.u32.totalorder %s1163_s27, %s1320_s1 }
  0x17   :  { %p1169_p10 = pnand %p1167_p9, %p1164_p8 }
  0x19   :  { %1172 = shalt.err (!%p1169_p10)
}
  0x1a   :  { %s1173_s4 = scalar_lea.vmem %s28_s24, 512  ;;  %p1178_p12 = scmp.lt.s32.totalorder %s28_s24, %s28_s24 }
  0x1b   :  { %p1174_p11 = scmp.ne.s32.totalorder %s28_s24, %s1173_s4  ;;  %p1179_p13 = scmp.lt.s32.totalorder %s1173_s4, %s1173_s4 }
  0x1d   :  { %p1180_p0 = por %p1179_p13, %p1178_p12 }
  0x1f   :  { %p1181_p1 = pnand %p1180_p0, %p1174_p11 }
  0x21   :  { %1184 = shalt.err (!%p1181_p1)
}
  0x22   :  { %s1217_s0 = smov 64   ;;  %s1218_s5 = smov 4  }
  0x23   :  { %33 = dma.hbm_to_vmem [thread:$0]  %s1320_s1, 512, %s28_s24, [#allocation7], %s1217_s0, %s1217_s0, %s1218_s5  }
  0x24   :  { %1207 = dma.done.wait [#allocation4], 896  }
  0x25   :  { %1208 = vsyncadd [#allocation4], 4294966400 }
  0x26   :  { %1209 = dma.done.wait [#allocation7], 512  }
  0x27   :  { %1210 = vsyncadd [#allocation7], 4294966784  ;;  %v1219_v0 = vmov 0   ;;  %v1125_v1 = vld [vmem:[#allocation3 + $0x4] ss:$28 sps:$4 sm:$0xff]   ;;  %s1220_s8 = smov 127  }
  0x28   :  { %120 = vmatprep.mubr.bf16.mxu1 %v1219_v0  ;;  %336 = vmatprep.mubr.bf16.mxu0 %v1219_v0  ;;  %v1127_v2 = vld [vmem:[#allocation3] ss:$28 sps:$4 sm:$0xff]   ;;  %v1128_v3 = vld [vmem:[#allocation3 + $0x8] ss:$28 sps:$4 sm:$0xff]   ;;  %v1130_v4 = vld [vmem:[#allocation3 + $0x14] ss:$28 sps:$4 sm:$0xff]  }
  0x29   :  { %276 = vrot.lane.b32.xlu0 %v1125_v1, %s1220_s8  ;;  %88 = vmatprep.subr.bf16.mxu1 %v1125_v1  ;;  %v1134_v5 = vld [vmem:[#allocation3 + $0xc] ss:$28 sps:$4 sm:$0xff]   ;;  %vm84_vm0 = vcmask 130048   ;;  %v1132_v6 = vld [vmem:[#allocation3 + $0x18] ss:$28 sps:$4 sm:$0xff]   ;;  %s1221_s1 = smov 110  }
  0x2a   :  { %274 = vrot.lane.b32.xlu1 %v1127_v2, %s1220_s8  ;;  %89 = vmatpush1.bf16.msra.mxu1 %v1127_v2  ;;  %v1133_v7 = vld [vmem:[#allocation3 + $0x10] ss:$28 sps:$4 sm:$0xff]   ;;  %v1137_v8 = vld [vmem:[#allocation6] sm:$0xff]   ;;  %s1222_s9 = smov 109   ;;  %vm288_vm1 = vcmask 1039360   ;;  %v1138_v17 = vld [vmem:[#allocation6 + $0x8] sm:$0xff]  }
  0x2b   :  { %131 = vmatprep.subr.bf16.mxu1 %v1134_v5  ;;  %v1135_v9 = vld [vmem:[#allocation3 + $0x18] ss:$28 sps:$4 sm:$0xff]   ;;  %vm528_vm2 = vcmask 900096   ;;  %v1139_v33 = vld [vmem:[#allocation6 + $0x10] sm:$0xff]   ;;  %vm768_vm3 = vcmask 891904   ;;  %s1223_s10 = smov [#allocation8]  }
  0x2c   :  { %v1136_v10 = vld [vmem:[#allocation3 + $0x18] ss:$28 sps:$4 sm:$0xff]   ;;  %s1008_s11 = sshll.u32 %s1223_s10, 4  ;;  %s1009_s11 = int_to_ptr.vmem [resolvable:$true] %s1008_s11 }
  0x2d   :  { %278 = vrot.lane.b32.xlu0 %v1128_v3, %s1220_s8  ;;  %1028 = vmatmul.mubr.msk.bf16.vlgmr.msra.gmra.mrb[0].mxu1 %vm84_vm0, %v1137_v8  ;;  %v1140_v48 = vld [vmem:[#allocation6 + $0x18] sm:$0xff]   ;;  %s1185_s12 = scalar_lea.vmem %s1009_s11, 768  ;;  %p1190_p3 = scmp.lt.s32.totalorder %s1009_s11, %s1009_s11 }
  0x2e   :  { %284 = vrot.lane.b32.xlu1 %v1130_v4, %s1220_s8  ;;  %132 = vmatpush1.bf16.msra.mxu1 %v1128_v3  ;;  %p1186_p2 = scmp.ne.s32.totalorder %s1009_s11, %s1185_s12  ;;  %p1191_p4 = scmp.lt.s32.totalorder %s1185_s12, %s1185_s12 }
  0x2f   :  { %163 = vmatprep.mubr.bf16.mxu1 %v1219_v0  ;;  %174 = vmatprep.subr.bf16.mxu1 %v1130_v4 }
  0x30   :  { %p1192_p5 = por %p1191_p4, %p1190_p3 }
  0x31   :  { %286 = vrot.lane.b32.xlu0 %v1132_v6, %s1220_s8 }
  0x32   :  { %282 = vrot.lane.b32.xlu1 %v1133_v7, %s1220_s8  ;;  %p1193_p6 = pnand %p1192_p5, %p1186_p2 }
  0x35   :  { %516 = vrot.lane.b32.xlu0 %v1125_v1, %s1221_s1  ;;  %1029 = vmatmul.mubr.msk.bf16.vlgmr.msra.gmra.mrb[4].mxu1 %vm84_vm0, %v1137_v8 }
  0x36   :  { %518 = vrot.lane.b32.xlu1 %v1128_v3, %s1221_s1  ;;  %175 = vmatpush1.bf16.msra.mxu1 %v1133_v7 }
  0x37   :  { %206 = vmatprep.mubr.bf16.mxu1 %v1219_v0 }
  0x39   :  { %514 = vrot.lane.b32.xlu0 %v1127_v2, %s1221_s1 }
  0x3a   :  { %280 = vrot.lane.b32.xlu1 %v1134_v5, %s1220_s8 }
  0x3d   :  { %524 = vrot.lane.b32.xlu0 %v1130_v4, %s1221_s1  ;;  %1030 = vmatmul.mubr.msk.bf16.vlgmr.msra.gmra.mrb[8].mxu1 %vm84_vm0, %v1137_v8 }
  0x3e   :  { %526 = vrot.lane.b32.xlu1 %v1135_v9, %s1221_s1  ;;  %379 = vmatprep.mubr.bf16.mxu1 %v1219_v0 }
  0x41   :  { %522 = vrot.lane.b32.xlu0 %v1133_v7, %s1221_s1 }
  0x42   :  { %520 = vrot.lane.b32.xlu1 %v1134_v5, %s1221_s1 }
  0x45   :  { %756 = vrot.lane.b32.xlu0 %v1125_v1, %s1222_s9 }
  0x46   :  { %758 = vrot.lane.b32.xlu1 %v1128_v3, %s1222_s9 }
  0x49   :  { %754 = vrot.lane.b32.xlu0 %v1127_v2, %s1222_s9 }
  0x4a   :  { %764 = vrot.lane.b32.xlu1 %v1130_v4, %s1222_s9 }
  0x4d   :  { %766 = vrot.lane.b32.xlu0 %v1136_v10, %s1222_s9 }
  0x4e   :  { %762 = vrot.lane.b32.xlu1 %v1133_v7, %s1222_s9 }
  0x51   :  { %760 = vrot.lane.b32.xlu0 %v1134_v5, %s1222_s9 }
  0x9b   :  { %v277_v11 = vpop.permute.xlu0 %276 }
  0x9c   :  { %v275_v12 = vpop.permute.xlu1 %274 }
  0x9d   :  { %v289_v16 = vsel %vm288_vm1, %v275_v12, %v277_v11 }
  0x9f   :  { %v279_v13 = vpop.permute.xlu0 %278 }
  0xa0   :  { %v285_v14 = vpop.permute.xlu1 %284  ;;  %v290_v15 = vsel %vm288_vm1, %v277_v11, %v279_v13 }
  0xa1   :  { %304 = vmatprep.subr.bf16.mxu0 %v290_v15 }
  0xa2   :  { %305 = vmatpush1.bf16.msra.mxu0 %v289_v16 }
  0xa3   :  { %v287_v18 = vpop.permute.xlu0 %286 }
  0xa4   :  { %v283_v19 = vpop.permute.xlu1 %282  ;;  %v294_v20 = vsel %vm288_vm1, %v285_v14, %v287_v18 }
  0xa5   :  { %v293_v21 = vsel %vm288_vm1, %v283_v19, %v285_v14  ;;  %1039 = vmatmul.mubr.msk.bf16.vlgmr.msra.gmra.mrb[0].mxu0 %vm84_vm0, %v1138_v17  ;;  %390 = vmatprep.subr.bf16.mxu0 %v294_v20 }
  0xa6   :  { %391 = vmatpush1.bf16.msra.mxu0 %v293_v21  ;;  %422 = vmatprep.mubr.bf16.mxu0 %v1219_v0 }
  0xa7   :  { %v517_v22 = vpop.permute.xlu0 %516 }
  0xa8   :  { %v519_v23 = vpop.permute.xlu1 %518 }
  0xa9   :  { %v530_v24 = vsel %vm528_vm2, %v517_v22, %v519_v23 }
  0xaa   :  { %544 = vmatprep.subr.bf16.mxu0 %v530_v24 }
  0xab   :  { %v515_v25 = vpop.permute.xlu0 %514 }
  0xac   :  { %v529_v26 = vsel %vm528_vm2, %v515_v25, %v517_v22  ;;  %v281_v27 = vpop.permute.xlu1 %280 }
  0xad   :  { %v291_v28 = vsel %vm288_vm1, %v279_v13, %v281_v27  ;;  %v292_v29 = vsel %vm288_vm1, %v281_v27, %v283_v19  ;;  %1041 = vmatmul.mubr.msk.bf16.vlgmr.msra.gmra.mrb[4].mxu0 %vm84_vm0, %v1138_v17 }
  0xae   :  { %347 = vmatprep.subr.bf16.mxu1 %v292_v29  ;;  %545 = vmatpush1.bf16.msra.mxu0 %v529_v26 }
  0xaf   :  { %348 = vmatpush1.bf16.msra.mxu1 %v291_v28  ;;  %v525_v30 = vpop.permute.xlu0 %524  ;;  %576 = vmatprep.mubr.bf16.mxu0 %v1219_v0 }
  0xb0   :  { %v527_v31 = vpop.permute.xlu1 %526 }
  0xb1   :  { %v534_v32 = vsel %vm528_vm2, %v525_v30, %v527_v31 }
  0xb2   :  { %1040 = vmatmul.mubr.msk.bf16.vlgmr.msra.gmra.mrb[4].mxu1 %vm84_vm0, %v1138_v17  ;;  %630 = vmatprep.subr.bf16.mxu0 %v534_v32 }
  0xb3   :  { %v523_v34 = vpop.permute.xlu0 %522  ;;  %619 = vmatprep.mubr.bf16.mxu1 %v1219_v0 }
  0xb4   :  { %v533_v35 = vsel %vm528_vm2, %v523_v34, %v525_v30  ;;  %v521_v36 = vpop.permute.xlu1 %520 }
  0xb5   :  { %v531_v37 = vsel %vm528_vm2, %v519_v23, %v521_v36  ;;  %1050 = vmatmul.mubr.msk.bf16.vlgmr.msra.gmra.mrb[0].mxu0 %vm84_vm0, %v1139_v33  ;;  %v532_v38 = vsel %vm528_vm2, %v521_v36, %v523_v34 }
  0xb6   :  { %587 = vmatprep.subr.bf16.mxu1 %v532_v38  ;;  %631 = vmatpush1.bf16.msra.mxu0 %v533_v35 }
  0xb7   :  { %588 = vmatpush1.bf16.msra.mxu1 %v531_v37  ;;  %v757_v39 = vpop.permute.xlu0 %756  ;;  %662 = vmatprep.mubr.bf16.mxu0 %v1219_v0 }
  0xb8   :  { %v759_v40 = vpop.permute.xlu1 %758 }
  0xb9   :  { %v770_v41 = vsel %vm768_vm3, %v757_v39, %v759_v40 }
  0xba   :  { %784 = vmatprep.subr.bf16.mxu0 %v770_v41 }
  0xbb   :  { %v755_v42 = vpop.permute.xlu0 %754 }
  0xbc   :  { %v769_v43 = vsel %vm768_vm3, %v755_v42, %v757_v39  ;;  %v765_v44 = vpop.permute.xlu1 %764 }
  0xbd   :  { %1052 = vmatmul.mubr.msk.bf16.vlgmr.msra.gmra.mrb[4].mxu0 %vm84_vm0, %v1139_v33 }
  0xbe   :  { %1051 = vmatmul.mubr.msk.bf16.vlgmr.msra.gmra.mrb[4].mxu1 %vm84_vm0, %v1139_v33  ;;  %785 = vmatpush1.bf16.msra.mxu0 %v769_v43 }
  0xbf   :  { %v767_v45 = vpop.permute.xlu0 %766  ;;  %816 = vmatprep.mubr.bf16.mxu0 %v1219_v0  ;;  %859 = vmatprep.mubr.bf16.mxu1 %v1219_v0 }
  0xc0   :  { %v763_v46 = vpop.permute.xlu1 %762  ;;  %v774_v47 = vsel %vm768_vm3, %v765_v44, %v767_v45 }
  0xc1   :  { %870 = vmatprep.subr.bf16.mxu0 %v774_v47  ;;  %v773_v49 = vsel %vm768_vm3, %v763_v46, %v765_v44 }
  0xc3   :  { %v761_v50 = vpop.permute.xlu0 %760 }
  0xc4   :  { %v771_v51 = vsel %vm768_vm3, %v759_v40, %v761_v50  ;;  %v772_v52 = vsel %vm768_vm3, %v761_v50, %v763_v46 }
  0xc5   :  { %1061 = vmatmul.mubr.msk.bf16.vlgmr.msra.gmra.mrb[0].mxu0 %vm84_vm0, %v1140_v48  ;;  %827 = vmatprep.subr.bf16.mxu1 %v772_v52 }
  0xc6   :  { %871 = vmatpush1.bf16.msra.mxu0 %v773_v49  ;;  %828 = vmatpush1.bf16.msra.mxu1 %v771_v51 }
  0xc7   :  { %902 = vmatprep.mubr.bf16.mxu0 %v1219_v0 }
  0xca   :  { %1062 = vmatmul.mubr.msk.bf16.vlgmr.msra.gmra.mrb[4].mxu1 %vm84_vm0, %v1140_v48 }
  0xcd   :  { %1063 = vmatmul.mubr.msk.bf16.vlgmr.msra.gmra.mrb[4].mxu0 %vm84_vm0, %v1140_v48 }
 0x100   :  { %v122_v53 = vpop.f32.mrb[0].mxu1 }
 0x101   :  { %v124_v54 = vpop.f32.mrb[1].mxu1 }
 0x102   :  { %v126_v55 = vpop.f32.mrb[2].mxu1 }
 0x103   :  { %v128_v56 = vpop.f32.mrb[3].mxu1 }
 0x110   :  { %v208_v57 = vpop.f32.mrb[8].mxu1 }
 0x111   :  { %v210_v58 = vpop.f32.mrb[9].mxu1 }
 0x112   :  { %v212_v59 = vpop.f32.mrb[10].mxu1 }
 0x113   :  { %v214_v60 = vpop.f32.mrb[11].mxu1 }
 0x198   :  { %v818_v61 = vpop.f32.mrb[0].mxu0 }
 0x199   :  { %v1076_v62 = vadd.f32 %v818_v61, %v122_v53  ;;  %v820_v63 = vpop.f32.mrb[1].mxu0 }
 0x19a   :  { %v1077_v1 = vadd.f32 %v820_v63, %v124_v54  ;;  %v822_v2 = vpop.f32.mrb[2].mxu0 }
 0x19b   :  { %v1078_v3 = vadd.f32 %v822_v2, %v126_v55  ;;  %v824_v4 = vpop.f32.mrb[3].mxu0 }
 0x19c   :  { %v1070_v0 = vpack.c.bf16 %v1077_v1, %v1076_v62  ;;  %v1079_v5 = vadd.f32 %v824_v4, %v128_v56 }
 0x19d   :  { %v861_v6 = vpop.f32.mrb[4].mxu1 }
 0x19e   :  { %997 = vst [vmem:[#allocation8] sm:$0xff] %v1070_v0  ;;  %v1073_v7 = vpack.c.bf16 %v1079_v5, %v1078_v3  ;;  %v863_v8 = vpop.f32.mrb[5].mxu1 }
 0x19f   :  { %v1071_v9 = vpack.c.bf16 %v863_v8, %v861_v6  ;;  %v865_v10 = vpop.f32.mrb[6].mxu1 }
 0x1a0   :  { %1000 = vst [vmem:[#allocation8 + $0x18] sm:$0xff] %v1073_v7  ;;  %v867_v11 = vpop.f32.mrb[7].mxu1  ;;  %v904_v12 = vpop.f32.mrb[4].mxu0 }
 0x1a1   :  { %998 = vst [vmem:[#allocation8 + $0x8] sm:$0xff] %v1071_v9  ;;  %v1074_v13 = vpack.c.bf16 %v867_v11, %v865_v10  ;;  %v1080_v14 = vadd.f32 %v904_v12, %v208_v57  ;;  %v906_v15 = vpop.f32.mrb[5].mxu0 }
 0x1a2   :  { %v1081_v16 = vadd.f32 %v906_v15, %v210_v58  ;;  %v908_v17 = vpop.f32.mrb[6].mxu0 }
 0x1a3   :  { %1001 = vst [vmem:[#allocation8 + $0x20] sm:$0xff] %v1074_v13  ;;  %v1082_v18 = vadd.f32 %v908_v17, %v212_v59  ;;  %v910_v19 = vpop.f32.mrb[7].mxu0 }
 0x1a4   :  { %v1072_v20 = vpack.c.bf16 %v1081_v16, %v1080_v14  ;;  %v1083_v21 = vadd.f32 %v910_v19, %v214_v60 }
 0x1a6   :  { %999 = vst [vmem:[#allocation8 + $0x10] sm:$0xff] %v1072_v20  ;;  %v1075_v22 = vpack.c.bf16 %v1083_v21, %v1082_v18 }
 0x1a8   :  { %1002 = vst [vmem:[#allocation8 + $0x28] sm:$0xff] %v1075_v22 }
 0x1a9   :  { %1196 = shalt.err (!%p1193_p6)
}
 0x1aa   :  { %s1197_s15 = scalar_lea.hbm %s1321_s2, 768 }
 0x1ab   :  { %p1198_p7 = scmp.ne.s32.totalorder %s1321_s2, %s1197_s15  ;;  %p1201_p8 = scmp.lt.u32.totalorder %s1197_s15, %s1321_s2 }
 0x1ad   :  { %p1203_p9 = pnand %p1201_p8, %p1198_p7 }
 0x1af   :  { %1206 = shalt.err (!%p1203_p9)
}
 0x1b0   :  { %s1224_s20 = smov 384   ;;  %s1225_s21 = smov 24  }
 0x1b1   :  { %1014 = dma.vmem_to_hbm [thread:$0]  %s1009_s11, 768, %s1321_s2, [#allocation5], %s1224_s20, %s1224_s20, %s1225_s21  }
 0x1b2   :  { %1211 = dma.done.wait [#allocation5], 768  }
 0x1b3   :  { %1212 = vsyncadd [#allocation5], 4294966528 }
 0x1b4   :  { %1018 = vsyncpa [#allocation4], 1 }
 0x1b5   :  { %1019 = vsyncpa [#allocation7], 1 }
 0x1b6   :  { %1020 = vsyncpa [#allocation5], 1 }

</bundles_post_ra>
